<compile_context>
chip_gen: v6e
topology: v6e:2x2x1
jax: 0.10.0
libtpu: 0.0.40
codegen_flags: <defaults>
</compile_context>

<pallas_src>
import functools

import jax
import jax.numpy as jnp
from jax import lax
from jax.experimental import pallas as pl
from jax.experimental.pallas import tpu as pltpu


# ---------------------------------------------------------------------------
# Pallas kernels
# ---------------------------------------------------------------------------

def _matmul_bias_kernel(x_ref, w_ref, b_ref, o_ref, *, activation):
    y = jnp.dot(x_ref[...], w_ref[...], preferred_element_type=jnp.float32)
    y = y + b_ref[...]
    if activation == "relu":
        y = jnp.maximum(y, 0.0)
    o_ref[...] = y.astype(o_ref.dtype)


def _pick_tile(m, cap=512):
    for t in (cap, 256, 128, 64, 32, 16, 8):
        if t <= m and m % t == 0:
            return t
    return m


def matmul_bias_act(x, w, b, activation="none", tile_m=512):
    """(M,K)@(K,N) + bias with fused activation; M-tiled parallel grid."""
    M, K = x.shape
    K2, N = w.shape
    assert K == K2
    tm = _pick_tile(M, tile_m)
    return pl.pallas_call(
        functools.partial(_matmul_bias_kernel, activation=activation),
        out_shape=jax.ShapeDtypeStruct((M, N), jnp.float32),
        grid=(M // tm,),
        in_specs=[pl.BlockSpec((tm, K), lambda i: (i, 0)),
                  pl.BlockSpec((K, N), lambda i: (0, 0)),
                  pl.BlockSpec((1, N), lambda i: (0, 0))],
        out_specs=pl.BlockSpec((tm, N), lambda i: (i, 0)),
        compiler_params=pltpu.CompilerParams(
            dimension_semantics=("parallel",)),
    )(x, w, b.reshape(1, N))


def _local_block_kernel(h_ref, w1g_ref, b1g_ref, w2_ref, b2_ref, o_ref,
                        pad_ref):
    """Fused residual block: [conv1(3-tap) | gate(1x1)] -> relu -> conv2(3-tap)
    -> relu(residual) * sigmoid(gate).  Everything stays in VMEM."""
    L, F = h_ref.shape[1], h_ref.shape[2]
    h = h_ref[0]                                         # (L, F) f32

    # zero-padded staging buffer -> the 3 conv taps are plain shifted reads
    pad_ref[...] = jnp.zeros_like(pad_ref)
    pad_ref[pl.ds(1, L), :] = h
    hm = pad_ref[pl.ds(0, L), :].astype(jnp.bfloat16)    # h[t-1]
    hc = pad_ref[pl.ds(1, L), :].astype(jnp.bfloat16)    # h[t]
    hp = pad_ref[pl.ds(2, L), :].astype(jnp.bfloat16)    # h[t+1]

    # conv1 and the 1x1 gate conv share input h -> one widened (F, 2F) matmul
    yg = (jnp.dot(hm, w1g_ref[0], preferred_element_type=jnp.float32)
          + jnp.dot(hc, w1g_ref[1], preferred_element_type=jnp.float32)
          + jnp.dot(hp, w1g_ref[2], preferred_element_type=jnp.float32)
          + b1g_ref[...])                                # (L, 2F)
    y1 = jnp.maximum(yg[:, :F], 0.0)                     # conv1 + ReLU
    g = yg[:, F:]                                        # gate logits

    # second 3-tap conv, reusing the same padded staging buffer
    pad_ref[pl.ds(1, L), :] = y1
    ym = pad_ref[pl.ds(0, L), :].astype(jnp.bfloat16)
    yc = pad_ref[pl.ds(1, L), :].astype(jnp.bfloat16)
    yp = pad_ref[pl.ds(2, L), :].astype(jnp.bfloat16)
    y2 = (jnp.dot(ym, w2_ref[0], preferred_element_type=jnp.float32)
          + jnp.dot(yc, w2_ref[1], preferred_element_type=jnp.float32)
          + jnp.dot(yp, w2_ref[2], preferred_element_type=jnp.float32)
          + b2_ref[...])                                 # (L, F)

    out = jnp.maximum(y2 + h, 0.0) * jax.nn.sigmoid(g)   # residual + gate
    o_ref[0] = out.astype(o_ref.dtype)


def local_activation_block(h, blk):
    """h: (B, L, F) channel-last.  One fused pallas_call per residual block."""
    # TODO(synk): for long sequences, additionally tile L with a halo instead
    # of one (L, F) tile per batch sample.
    B, L, F = h.shape
    return pl.pallas_call(
        _local_block_kernel,
        out_shape=jax.ShapeDtypeStruct((B, L, F), jnp.float32),
        grid=(B,),
        in_specs=[
            pl.BlockSpec((1, L, F), lambda b: (b, 0, 0)),       # h tile
            pl.BlockSpec((3, F, 2 * F), lambda b: (0, 0, 0)),   # conv1|gate taps
            pl.BlockSpec((1, 2 * F), lambda b: (0, 0)),         # bias1|bias_g
            pl.BlockSpec((3, F, F), lambda b: (0, 0, 0)),       # conv2 taps
            pl.BlockSpec((1, F), lambda b: (0, 0)),             # bias2
        ],
        out_specs=pl.BlockSpec((1, L, F), lambda b: (b, 0, 0)),
        scratch_shapes=[pltpu.VMEM((L + 2, F), jnp.float32)],
        compiler_params=pltpu.CompilerParams(
            dimension_semantics=("parallel",)),
    )(h, blk["w1g"], blk["b1g"], blk["w2"], blk["b2"])


def _amil_kernel(h_ref, m_ref, vu_ref, bvu_ref, w_ref, bw_ref, wr_ref, br_ref,
                 risk_ref, attn_ref):
    h = h_ref[0]                                         # (N, F) f32
    mask = m_ref[0]                                      # (1, N) f32
    d = vu_ref.shape[1] // 2

    # gated attention: V and U share input h -> one (F, 2D) matmul
    a = jnp.dot(h.astype(jnp.bfloat16), vu_ref[...],
                preferred_element_type=jnp.float32) + bvu_ref[...]     # (N, 2D)
    gated = jnp.tanh(a[:, :d]) * jax.nn.sigmoid(a[:, d:])              # (N, D)

    # attention scores as a lane-dense (1, N) row:  w_row @ gated^T
    scores = lax.dot_general(w_ref[...], gated, (((1,), (1,)), ((), ())),
                             preferred_element_type=jnp.float32)
    scores = scores + bw_ref[...]                                      # (1, N)

    valid = mask > 0.0
    scores = jnp.where(valid, scores, -1e30)
    smax = jnp.max(scores, axis=1, keepdims=True)                      # (1, 1)
    e = jnp.where(valid, jnp.exp(scores - smax), 0.0)                  # (1, N)
    denom = jnp.sum(e, axis=1, keepdims=True)                          # (1, 1)
    # guard the all-masked (denom == 0) case; divide on the EUP
    attn = e * pl.reciprocal(jnp.maximum(denom, 1e-20), approx=True)   # (1, N)

    z = jnp.dot(attn, h, preferred_element_type=jnp.float32)           # (1, F)
    risk = jnp.dot(z, wr_ref[...],
                   preferred_element_type=jnp.float32) + br_ref[...]   # (1, 1)

    risk_ref[0] = risk.astype(risk_ref.dtype)
    attn_ref[0] = attn.astype(attn_ref.dtype)


def attention_pooling(h, mask, amil):
    """h: (B, N, F) instances; mask: (B, N). Returns risk (B,1), attn (B,N)."""
    # TODO(synk): for very large N, tile N with an online (flash-style) masked
    # softmax instead of one (N, F) block per batch element.
    B, N, F = h.shape
    D2 = amil["VU"].shape[1]
    D = amil["w_row"].shape[1]
    risk, attn = pl.pallas_call(
        _amil_kernel,
        out_shape=(jax.ShapeDtypeStruct((B, 1, 1), jnp.float32),
                   jax.ShapeDtypeStruct((B, 1, N), jnp.float32)),
        grid=(B,),
        in_specs=[
            pl.BlockSpec((1, N, F), lambda b: (b, 0, 0)),   # instances
            pl.BlockSpec((1, 1, N), lambda b: (b, 0, 0)),   # mask (lane-dense)
            pl.BlockSpec((F, D2), lambda b: (0, 0)),        # V|U
            pl.BlockSpec((1, D2), lambda b: (0, 0)),        # bV|bU
            pl.BlockSpec((1, D), lambda b: (0, 0)),         # w (row)
            pl.BlockSpec((1, 1), lambda b: (0, 0)),         # bw
            pl.BlockSpec((F, 1), lambda b: (0, 0)),         # W_risk
            pl.BlockSpec((1, 1), lambda b: (0, 0)),         # b_risk
        ],
        out_specs=(pl.BlockSpec((1, 1, 1), lambda b: (b, 0, 0)),
                   pl.BlockSpec((1, 1, N), lambda b: (b, 0, 0))),
        compiler_params=pltpu.CompilerParams(
            dimension_semantics=("parallel",)),
    )(h, mask.reshape(B, 1, N), amil["VU"], amil["bVU"], amil["w_row"],
      amil["bw"], amil["Wr"], amil["br"])
    return risk.reshape(B, 1), attn.reshape(B, N)


# ---------------------------------------------------------------------------
# ResNet glue
# ---------------------------------------------------------------------------

def stem_conv(x, pp):
    """x: (B, C_in, L) NCW.  Returns (B, L_out, F) channel-last features."""
    # TODO(synk): the strided stem conv still gathers K*C patches in XLA
    # (transpose-free); the residual blocks avoid im2col entirely in-kernel.
    cfg = pp["stem_cfg"]
    K, stride, pad = cfg["kernel"], cfg["stride"], cfg["pad"]
    h = x.transpose(0, 2, 1)                             # (B, L, C)
    B, L, C = h.shape
    hp = jnp.pad(h, ((0, 0), (pad, pad), (0, 0)))
    L_out = (L + 2 * pad - K) // stride + 1
    pos = jnp.arange(L_out)[:, None] * stride + jnp.arange(K)[None, :]
    patches = hp[:, pos, :].reshape(B * L_out, K * C).astype(jnp.bfloat16)
    y = matmul_bias_act(patches, pp["stem_w"], pp["stem_b"], "relu")
    return y.reshape(B, L_out, -1)


def cox_attention_resnet(x, mask, pp):
    h = stem_conv(x, pp)                                 # (B, N, F)
    for blk in pp["blocks"]:
        h = local_activation_block(h, blk)
    risk, attn = attention_pooling(h, mask, pp["amil"])
    return risk, attn


# ---------------------------------------------------------------------------
# Parameter init (raw, PyTorch-like layout) + one-time preparation
# ---------------------------------------------------------------------------

def _fold_bn(w, b, bn, eps=1e-5):
    """Fold eval-mode BatchNorm1d into conv weight/bias.  w: (F, C, K)."""
    gamma, beta, mean, var = bn
    scale = gamma / jnp.sqrt(var + eps)
    return w * scale[:, None, None], (b - mean) * scale + beta


def prepare_params(raw):
    """Fold BN, reorder/stack/concat weights, cast MXU operands to bf16 —
    done ONCE outside the jitted forward."""
    r = raw["resnet"]
    sw, sb = _fold_bn(r["stem_w"], r["stem_b"], r["stem_bn"])
    F, C, K = sw.shape
    stem_w = sw.transpose(2, 1, 0).reshape(K * C, F).astype(jnp.bfloat16)

    blocks = []
    for blk in r["blocks"]:
        w1, b1 = _fold_bn(blk["w1"], blk["b1"], blk["bn1"])     # (F, F, 3)
        w2, b2 = _fold_bn(blk["w2"], blk["b2"], blk["bn2"])     # (F, F, 3)
        wg, bg = _fold_bn(blk["wg"], blk["bg"], blk["bng"])     # (F, F, 1)
        fo = w1.shape[0]
        w1_t = [w1[:, :, k].T for k in range(3)]                # (F_in, F_out)
        w2_t = [w2[:, :, k].T for k in range(3)]
        wg_t = wg[:, :, 0].T
        zero = jnp.zeros_like(wg_t)
        w1g = jnp.stack([jnp.concatenate([w1_t[0], zero], axis=1),
                         jnp.concatenate([w1_t[1], wg_t], axis=1),
                         jnp.concatenate([w1_t[2], zero], axis=1)],
                        axis=0).astype(jnp.bfloat16)            # (3, F, 2F)
        blocks.append({
            "w1g": w1g,
            "b1g": jnp.concatenate([b1, bg]).reshape(1, 2 * fo),
            "w2": jnp.stack(w2_t, axis=0).astype(jnp.bfloat16),  # (3, F, F)
            "b2": b2.reshape(1, fo),
        })

    a = raw["amil"]
    d = a["V"].shape[1]
    amil = {
        "VU": jnp.concatenate([a["V"], a["U"]], axis=1).astype(jnp.bfloat16),
        "bVU": jnp.concatenate([a["bV"], a["bU"]]).reshape(1, 2 * d),
        "w_row": a["w"].T,                                       # (1, D)
        "bw": a["bw"].reshape(1, 1),
        "Wr": a["Wr"],                                           # (F, 1)
        "br": a["br"].reshape(1, 1),
    }
    return {"stem_w": stem_w, "stem_b": sb,
            "stem_cfg": {"kernel": K, "stride": 2, "pad": 3},
            "blocks": blocks, "amil": amil}


def init_params(key, c_in=4, feat=32, d_att=16):
    ks = iter(jax.random.split(key, 32))

    def nrm(shape, scale=0.1):
        return (scale * jax.random.normal(next(ks), shape)).astype(jnp.float32)

    def bn(f):  # (gamma, beta, running_mean, running_var) — eval mode
        return (jnp.ones((f,), jnp.float32), jnp.zeros((f,), jnp.float32),
                jnp.zeros((f,), jnp.float32), jnp.ones((f,), jnp.float32))

    block = {
        "w1": nrm((feat, feat, 3)), "b1": jnp.zeros((feat,), jnp.float32), "bn1": bn(feat),
        "w2": nrm((feat, feat, 3)), "b2": jnp.zeros((feat,), jnp.float32), "bn2": bn(feat),
        "wg": nrm((feat, feat, 1)), "bg": jnp.zeros((feat,), jnp.float32), "bng": bn(feat),
    }
    resnet = {
        "stem_w": nrm((feat, c_in, 7)),
        "stem_b": jnp.zeros((feat,), jnp.float32),
        "stem_bn": bn(feat),
        "blocks": [block],
    }
    amil = {
        "V": nrm((feat, d_att)), "bV": jnp.zeros((d_att,), jnp.float32),
        "U": nrm((feat, d_att)), "bU": jnp.zeros((d_att,), jnp.float32),
        "w": nrm((d_att, 1)), "bw": jnp.zeros((1,), jnp.float32),
        "Wr": nrm((feat, 1)), "br": jnp.zeros((1,), jnp.float32),
    }
    return {"resnet": resnet, "amil": amil}


# ---------------------------------------------------------------------------

if __name__ == "__main__":
    key = jax.random.PRNGKey(0)
    pkey, xkey = jax.random.split(key)

    B, C_IN, L = 2, 4, 32          # small NCW input
    FEAT, D_ATT = 32, 16
    N_INST = L // 2                # stride-2 stem -> 16 instances of 32 feats

    raw = init_params(pkey, c_in=C_IN, feat=FEAT, d_att=D_ATT)
    params = prepare_params(raw)   # BN fold / weight prep done once, outside jit

    x = jax.random.normal(xkey, (B, C_IN, L), dtype=jnp.float32)
    mask = jnp.ones((B, N_INST), dtype=jnp.float32)
    mask = mask.at[1, 12:].set(0.0)   # pad out last instances of sample 1

    fwd = jax.jit(lambda x, m: cox_attention_resnet(x, m, params))
    risk, attn = fwd(x, mask)
    jax.block_until_ready((risk, attn))

    assert risk.shape == (B, 1) and attn.shape == (B, N_INST)
    assert bool(jnp.all(jnp.isfinite(risk))) and bool(jnp.all(jnp.isfinite(attn)))
    # attention over valid instances sums to ~1 (approx reciprocal), pads get 0
    assert bool(jnp.allclose(attn.sum(-1), 1.0, atol=1e-2))
    assert bool(jnp.all(attn[1, 12:] == 0.0))
    print("KERNEL_OK")
</pallas_src>

<mosaic_0001>
module attributes {stable_mosaic.version = 11 : i64} {
  func.func @_matmul_bias_kernel(%arg0: i32, %arg1: memref<32x28xbf16, #tpu.memory_space<vmem>>, %arg2: memref<28x32xbf16, #tpu.memory_space<vmem>>, %arg3: memref<1x32xf32, #tpu.memory_space<vmem>>, %arg4: memref<32x32xf32, #tpu.memory_space<vmem>>) attributes {dimension_semantics = [#tpu.dimension_semantics<parallel>], iteration_bounds = array<i64: 1>, scalar_prefetch = 0 : i64, scratch_operands = 0 : i64, tpu.core_type = #tpu.core_type<tc>, window_params = [{transform_indices = @transform_0, window_bounds = array<i64: 32, 28>}, {pipeline_mode = #tpu.pipeline_mode<synchronous>, transform_indices = @transform_1, window_bounds = array<i64: 28, 32>}, {pipeline_mode = #tpu.pipeline_mode<synchronous>, transform_indices = @transform_2, window_bounds = array<i64: 1, 32>}, {transform_indices = @transform_3, window_bounds = array<i64: 32, 32>}]} {
    %c0 = arith.constant 0 : index
    %c0_0 = arith.constant 0 : index
    %0 = vector.load %arg1[%c0, %c0_0] : memref<32x28xbf16, #tpu.memory_space<vmem>>, vector<32x28xbf16>
    %c0_1 = arith.constant 0 : index
    %c0_2 = arith.constant 0 : index
    %1 = vector.load %arg2[%c0_1, %c0_2] : memref<28x32xbf16, #tpu.memory_space<vmem>>, vector<28x32xbf16>
    %cst = arith.constant dense<0.000000e+00> : vector<32x32xf32>
    %2 = tpu.matmul %0, %1, %cst {dimension_numbers = #tpu.dot_dimension_numbers<[1], [0], [0], [1], [0, 0, 1, 1], [], []>} : vector<32x28xbf16>, vector<28x32xbf16>, vector<32x32xf32> -> vector<32x32xf32>
    %c0_3 = arith.constant 0 : index
    %c0_4 = arith.constant 0 : index
    %3 = vector.load %arg3[%c0_3, %c0_4] : memref<1x32xf32, #tpu.memory_space<vmem>>, vector<1x32xf32>
    %4 = vector.broadcast %3 : vector<1x32xf32> to vector<32x32xf32>
    %5 = arith.addf %2, %4 : vector<32x32xf32>
    %cst_5 = arith.constant 0.000000e+00 : f32
    %6 = vector.broadcast %cst_5 : f32 to vector<32x32xf32>
    %7 = arith.maximumf %5, %6 : vector<32x32xf32>
    %c0_6 = arith.constant 0 : index
    %c0_7 = arith.constant 0 : index
    %8 = vector.load %arg4[%c0_6, %c0_7] : memref<32x32xf32, #tpu.memory_space<vmem>>, vector<32x32xf32>
    tpu.vector_store %arg4[%c0_6, %c0_7], %7 {strides = array<i32>} : memref<32x32xf32, #tpu.memory_space<vmem>>, vector<32x32xf32>,
    return
  }
  func.func @transform_0(%arg0: i32) -> (i32, i32) {
    %c0_i32 = arith.constant 0 : i32
    %c0_i32_0 = arith.constant 0 : i32
    return %arg0, %c0_i32 : i32, i32
  }
  func.func @transform_1(%arg0: i32) -> (i32, i32) {
    %c0_i32 = arith.constant 0 : i32
    %c0_i32_0 = arith.constant 0 : i32
    %c0_i32_1 = arith.constant 0 : i32
    return %c0_i32, %c0_i32_0 : i32, i32
  }
  func.func @transform_2(%arg0: i32) -> (i32, i32) {
    %c0_i32 = arith.constant 0 : i32
    %c0_i32_0 = arith.constant 0 : i32
    %c0_i32_1 = arith.constant 0 : i32
    return %c0_i32, %c0_i32_0 : i32, i32
  }
  func.func @transform_3(%arg0: i32) -> (i32, i32) {
    %c0_i32 = arith.constant 0 : i32
    %c0_i32_0 = arith.constant 0 : i32
    return %arg0, %c0_i32 : i32, i32
  }
}

module attributes {stable_mosaic.version = 11 : i64} {
  func.func @_local_block_kernel(%arg0: i32, %arg1: memref<1x16x32xf32, #tpu.memory_space<vmem>>, %arg2: memref<3x32x64xbf16, #tpu.memory_space<vmem>>, %arg3: memref<1x64xf32, #tpu.memory_space<vmem>>, %arg4: memref<3x32x32xbf16, #tpu.memory_space<vmem>>, %arg5: memref<1x32xf32, #tpu.memory_space<vmem>>, %arg6: memref<1x16x32xf32, #tpu.memory_space<vmem>>, %arg7: memref<18x32xf32, #tpu.memory_space<vmem>>) attributes {dimension_semantics = [#tpu.dimension_semantics<parallel>], iteration_bounds = array<i64: 2>, scalar_prefetch = 0 : i64, scratch_operands = 1 : i64, tpu.core_type = #tpu.core_type<tc>, window_params = [{transform_indices = @transform_0, window_bounds = array<i64: 1, 16, 32>}, {pipeline_mode = #tpu.pipeline_mode<synchronous>, transform_indices = @transform_1, window_bounds = array<i64: 3, 32, 64>}, {pipeline_mode = #tpu.pipeline_mode<synchronous>, transform_indices = @transform_2, window_bounds = array<i64: 1, 64>}, {pipeline_mode = #tpu.pipeline_mode<synchronous>, transform_indices = @transform_3, window_bounds = array<i64: 3, 32, 32>}, {pipeline_mode = #tpu.pipeline_mode<synchronous>, transform_indices = @transform_4, window_bounds = array<i64: 1, 32>}, {transform_indices = @transform_5, window_bounds = array<i64: 1, 16, 32>}]} {
    %c0 = arith.constant 0 : index
    %c0_0 = arith.constant 0 : index
    %c0_1 = arith.constant 0 : index
    %0 = vector.load %arg1[%c0, %c0_0, %c0_1] : memref<1x16x32xf32, #tpu.memory_space<vmem>>, vector<1x16x32xf32>
    %1 = vector.shape_cast %0 : vector<1x16x32xf32> to vector<16x32xf32>
    %cst = arith.constant 0.000000e+00 : f32
    %2 = vector.broadcast %cst : f32 to vector<18x32xf32>
    %c0_2 = arith.constant 0 : index
    %c0_3 = arith.constant 0 : index
    %3 = vector.load %arg7[%c0_2, %c0_3] : memref<18x32xf32, #tpu.memory_space<vmem>>, vector<18x32xf32>
    tpu.vector_store %arg7[%c0_2, %c0_3], %2 {strides = array<i32>} : memref<18x32xf32, #tpu.memory_space<vmem>>, vector<18x32xf32>,
    %c1 = arith.constant 1 : index
    %c0_4 = arith.constant 0 : index
    %4 = vector.load %arg7[%c1, %c0_4] : memref<18x32xf32, #tpu.memory_space<vmem>>, vector<16x32xf32>
    tpu.vector_store %arg7[%c1, %c0_4], %1 {strides = array<i32>} : memref<18x32xf32, #tpu.memory_space<vmem>>, vector<16x32xf32>,
    %c0_5 = arith.constant 0 : index
    %c0_6 = arith.constant 0 : index
    %5 = vector.load %arg7[%c0_5, %c0_6] : memref<18x32xf32, #tpu.memory_space<vmem>>, vector<16x32xf32>
    %6 = arith.truncf %5 : vector<16x32xf32> to vector<16x32xbf16>
    %c1_7 = arith.constant 1 : index
    %c0_8 = arith.constant 0 : index
    %7 = vector.load %arg7[%c1_7, %c0_8] : memref<18x32xf32, #tpu.memory_space<vmem>>, vector<16x32xf32>
    %8 = arith.truncf %7 : vector<16x32xf32> to vector<16x32xbf16>
    %c2 = arith.constant 2 : index
    %c0_9 = arith.constant 0 : index
    %9 = vector.load %arg7[%c2, %c0_9] : memref<18x32xf32, #tpu.memory_space<vmem>>, vector<16x32xf32>
    %10 = arith.truncf %9 : vector<16x32xf32> to vector<16x32xbf16>
    %c0_10 = arith.constant 0 : index
    %c0_11 = arith.constant 0 : index
    %c0_12 = arith.constant 0 : index
    %11 = vector.load %arg2[%c0_10, %c0_11, %c0_12] : memref<3x32x64xbf16, #tpu.memory_space<vmem>>, vector<1x32x64xbf16>
    %12 = vector.shape_cast %11 : vector<1x32x64xbf16> to vector<32x64xbf16>
    %cst_13 = arith.constant dense<0.000000e+00> : vector<16x64xf32>
    %13 = tpu.matmul %6, %12, %cst_13 {dimension_numbers = #tpu.dot_dimension_numbers<[1], [0], [0], [1], [0, 0, 1, 1], [], []>} : vector<16x32xbf16>, vector<32x64xbf16>, vector<16x64xf32> -> vector<16x64xf32>
    %c1_14 = arith.constant 1 : index
    %c0_15 = arith.constant 0 : index
    %c0_16 = arith.constant 0 : index
    %14 = vector.load %arg2[%c1_14, %c0_15, %c0_16] : memref<3x32x64xbf16, #tpu.memory_space<vmem>>, vector<1x32x64xbf16>
    %15 = vector.shape_cast %14 : vector<1x32x64xbf16> to vector<32x64xbf16>
    %cst_17 = arith.constant dense<0.000000e+00> : vector<16x64xf32>
    %16 = tpu.matmul %8, %15, %cst_17 {dimension_numbers = #tpu.dot_dimension_numbers<[1], [0], [0], [1], [0, 0, 1, 1], [], []>} : vector<16x32xbf16>, vector<32x64xbf16>, vector<16x64xf32> -> vector<16x64xf32>
    %17 = arith.addf %13, %16 : vector<16x64xf32>
    %c2_18 = arith.constant 2 : index
    %c0_19 = arith.constant 0 : index
    %c0_20 = arith.constant 0 : index
    %18 = vector.load %arg2[%c2_18, %c0_19, %c0_20] : memref<3x32x64xbf16, #tpu.memory_space<vmem>>, vector<1x32x64xbf16>
    %19 = vector.shape_cast %18 : vector<1x32x64xbf16> to vector<32x64xbf16>
    %cst_21 = arith.constant dense<0.000000e+00> : vector<16x64xf32>
    %20 = tpu.matmul %10, %19, %cst_21 {dimension_numbers = #tpu.dot_dimension_numbers<[1], [0], [0], [1], [0, 0, 1, 1], [], []>} : vector<16x32xbf16>, vector<32x64xbf16>, vector<16x64xf32> -> vector<16x64xf32>
    %21 = arith.addf %17, %20 : vector<16x64xf32>
    %c0_22 = arith.constant 0 : index
    %c0_23 = arith.constant 0 : index
    %22 = vector.load %arg3[%c0_22, %c0_23] : memref<1x64xf32, #tpu.memory_space<vmem>>, vector<1x64xf32>
    %23 = vector.broadcast %22 : vector<1x64xf32> to vector<16x64xf32>
    %24 = arith.addf %21, %23 : vector<16x64xf32>
    %25 = vector.extract_strided_slice %24 {offsets = [0, 0], sizes = [16, 32], strides = [1, 1]} : vector<16x64xf32> to vector<16x32xf32>
    %cst_24 = arith.constant 0.000000e+00 : f32
    %26 = vector.broadcast %cst_24 : f32 to vector<16x32xf32>
    %27 = arith.maximumf %25, %26 : vector<16x32xf32>
    %28 = vector.extract_strided_slice %24 {offsets = [0, 32], sizes = [16, 32], strides = [1, 1]} : vector<16x64xf32> to vector<16x32xf32>
    %c1_25 = arith.constant 1 : index
    %c0_26 = arith.constant 0 : index
    %29 = vector.load %arg7[%c1_25, %c0_26] : memref<18x32xf32, #tpu.memory_space<vmem>>, vector<16x32xf32>
    tpu.vector_store %arg7[%c1_25, %c0_26], %27 {strides = array<i32>} : memref<18x32xf32, #tpu.memory_space<vmem>>, vector<16x32xf32>,
    %c0_27 = arith.constant 0 : index
    %c0_28 = arith.constant 0 : index
    %30 = vector.load %arg7[%c0_27, %c0_28] : memref<18x32xf32, #tpu.memory_space<vmem>>, vector<16x32xf32>
    %31 = arith.truncf %30 : vector<16x32xf32> to vector<16x32xbf16>
    %c1_29 = arith.constant 1 : index
    %c0_30 = arith.constant 0 : index
    %32 = vector.load %arg7[%c1_29, %c0_30] : memref<18x32xf32, #tpu.memory_space<vmem>>, vector<16x32xf32>
    %33 = arith.truncf %32 : vector<16x32xf32> to vector<16x32xbf16>
    %c2_31 = arith.constant 2 : index
    %c0_32 = arith.constant 0 : index
    %34 = vector.load %arg7[%c2_31, %c0_32] : memref<18x32xf32, #tpu.memory_space<vmem>>, vector<16x32xf32>
    %35 = arith.truncf %34 : vector<16x32xf32> to vector<16x32xbf16>
    %c0_33 = arith.constant 0 : index
    %c0_34 = arith.constant 0 : index
    %c0_35 = arith.constant 0 : index
    %36 = vector.load %arg4[%c0_33, %c0_34, %c0_35] : memref<3x32x32xbf16, #tpu.memory_space<vmem>>, vector<1x32x32xbf16>
    %37 = vector.shape_cast %36 : vector<1x32x32xbf16> to vector<32x32xbf16>
    %cst_36 = arith.constant dense<0.000000e+00> : vector<16x32xf32>
    %38 = tpu.matmul %31, %37, %cst_36 {dimension_numbers = #tpu.dot_dimension_numbers<[1], [0], [0], [1], [0, 0, 1, 1], [], []>} : vector<16x32xbf16>, vector<32x32xbf16>, vector<16x32xf32> -> vector<16x32xf32>
    %c1_37 = arith.constant 1 : index
    %c0_38 = arith.constant 0 : index
    %c0_39 = arith.constant 0 : index
    %39 = vector.load %arg4[%c1_37, %c0_38, %c0_39] : memref<3x32x32xbf16, #tpu.memory_space<vmem>>, vector<1x32x32xbf16>
    %40 = vector.shape_cast %39 : vector<1x32x32xbf16> to vector<32x32xbf16>
    %cst_40 = arith.constant dense<0.000000e+00> : vector<16x32xf32>
    %41 = tpu.matmul %33, %40, %cst_40 {dimension_numbers = #tpu.dot_dimension_numbers<[1], [0], [0], [1], [0, 0, 1, 1], [], []>} : vector<16x32xbf16>, vector<32x32xbf16>, vector<16x32xf32> -> vector<16x32xf32>
    %42 = arith.addf %38, %41 : vector<16x32xf32>
    %c2_41 = arith.constant 2 : index
    %c0_42 = arith.constant 0 : index
    %c0_43 = arith.constant 0 : index
    %43 = vector.load %arg4[%c2_41, %c0_42, %c0_43] : memref<3x32x32xbf16, #tpu.memory_space<vmem>>, vector<1x32x32xbf16>
    %44 = vector.shape_cast %43 : vector<1x32x32xbf16> to vector<32x32xbf16>
    %cst_44 = arith.constant dense<0.000000e+00> : vector<16x32xf32>
    %45 = tpu.matmul %35, %44, %cst_44 {dimension_numbers = #tpu.dot_dimension_numbers<[1], [0], [0], [1], [0, 0, 1, 1], [], []>} : vector<16x32xbf16>, vector<32x32xbf16>, vector<16x32xf32> -> vector<16x32xf32>
    %46 = arith.addf %42, %45 : vector<16x32xf32>
    %c0_45 = arith.constant 0 : index
    %c0_46 = arith.constant 0 : index
    %47 = vector.load %arg5[%c0_45, %c0_46] : memref<1x32xf32, #tpu.memory_space<vmem>>, vector<1x32xf32>
    %48 = vector.broadcast %47 : vector<1x32xf32> to vector<16x32xf32>
    %49 = arith.addf %46, %48 : vector<16x32xf32>
    %50 = arith.addf %49, %1 : vector<16x32xf32>
    %cst_47 = arith.constant 0.000000e+00 : f32
    %51 = vector.broadcast %cst_47 : f32 to vector<16x32xf32>
    %52 = arith.maximumf %50, %51 : vector<16x32xf32>
    %53 = arith.negf %28 : vector<16x32xf32>
    %54 = math.exp %53 : vector<16x32xf32>
    %cst_48 = arith.constant 1.000000e+00 : f32
    %55 = vector.broadcast %cst_48 : f32 to vector<16x32xf32>
    %56 = arith.addf %55, %54 : vector<16x32xf32>
    %57 = arith.divf %55, %56 : vector<16x32xf32>
    %58 = arith.mulf %52, %57 : vector<16x32xf32>
    %c0_49 = arith.constant 0 : index
    %c0_50 = arith.constant 0 : index
    %c0_51 = arith.constant 0 : index
    %59 = vector.load %arg6[%c0_49, %c0_50, %c0_51] : memref<1x16x32xf32, #tpu.memory_space<vmem>>, vector<1x16x32xf32>
    %60 = vector.shape_cast %59 : vector<1x16x32xf32> to vector<16x32xf32>
    %61 = vector.shape_cast %58 : vector<16x32xf32> to vector<1x16x32xf32>
    tpu.vector_store %arg6[%c0_49, %c0_50, %c0_51], %61 {strides = array<i32>} : memref<1x16x32xf32, #tpu.memory_space<vmem>>, vector<1x16x32xf32>,
    return
  }
  func.func @transform_0(%arg0: i32) -> (i32, i32, i32) {
    %c0_i32 = arith.constant 0 : i32
    %c0_i32_0 = arith.constant 0 : i32
    %c0_i32_1 = arith.constant 0 : i32
    return %arg0, %c0_i32, %c0_i32_0 : i32, i32, i32
  }
  func.func @transform_1(%arg0: i32) -> (i32, i32, i32) {
    %c0_i32 = arith.constant 0 : i32
    %c0_i32_0 = arith.constant 0 : i32
    %c0_i32_1 = arith.constant 0 : i32
    %c0_i32_2 = arith.constant 0 : i32
    return %c0_i32, %c0_i32_0, %c0_i32_1 : i32, i32, i32
  }
  func.func @transform_2(%arg0: i32) -> (i32, i32) {
    %c0_i32 = arith.constant 0 : i32
    %c0_i32_0 = arith.constant 0 : i32
    %c0_i32_1 = arith.constant 0 : i32
    return %c0_i32, %c0_i32_0 : i32, i32
  }
  func.func @transform_3(%arg0: i32) -> (i32, i32, i32) {
    %c0_i32 = arith.constant 0 : i32
    %c0_i32_0 = arith.constant 0 : i32
    %c0_i32_1 = arith.constant 0 : i32
    %c0_i32_2 = arith.constant 0 : i32
    return %c0_i32, %c0_i32_0, %c0_i32_1 : i32, i32, i32
  }
  func.func @transform_4(%arg0: i32) -> (i32, i32) {
    %c0_i32 = arith.constant 0 : i32
    %c0_i32_0 = arith.constant 0 : i32
    %c0_i32_1 = arith.constant 0 : i32
    return %c0_i32, %c0_i32_0 : i32, i32
  }
  func.func @transform_5(%arg0: i32) -> (i32, i32, i32) {
    %c0_i32 = arith.constant 0 : i32
    %c0_i32_0 = arith.constant 0 : i32
    %c0_i32_1 = arith.constant 0 : i32
    return %arg0, %c0_i32, %c0_i32_0 : i32, i32, i32
  }
}

module attributes {stable_mosaic.version = 11 : i64} {
  func.func @_amil_kernel(%arg0: i32, %arg1: memref<1x16x32xf32, #tpu.memory_space<vmem>>, %arg2: memref<1x1x16xf32, #tpu.memory_space<vmem>>, %arg3: memref<32x32xbf16, #tpu.memory_space<vmem>>, %arg4: memref<1x32xf32, #tpu.memory_space<vmem>>, %arg5: memref<1x16xf32, #tpu.memory_space<vmem>>, %arg6: memref<1x1xf32, #tpu.memory_space<vmem>>, %arg7: memref<32x1xf32, #tpu.memory_space<vmem>>, %arg8: memref<1x1xf32, #tpu.memory_space<vmem>>, %arg9: memref<1x1x1xf32, #tpu.memory_space<vmem>>, %arg10: memref<1x1x16xf32, #tpu.memory_space<vmem>>) attributes {dimension_semantics = [#tpu.dimension_semantics<parallel>], iteration_bounds = array<i64: 2>, scalar_prefetch = 0 : i64, scratch_operands = 0 : i64, tpu.core_type = #tpu.core_type<tc>, window_params = [{transform_indices = @transform_0, window_bounds = array<i64: 1, 16, 32>}, {transform_indices = @transform_1, window_bounds = array<i64: 1, 1, 16>}, {pipeline_mode = #tpu.pipeline_mode<synchronous>, transform_indices = @transform_2, window_bounds = array<i64: 32, 32>}, {pipeline_mode = #tpu.pipeline_mode<synchronous>, transform_indices = @transform_3, window_bounds = array<i64: 1, 32>}, {pipeline_mode = #tpu.pipeline_mode<synchronous>, transform_indices = @transform_4, window_bounds = array<i64: 1, 16>}, {pipeline_mode = #tpu.pipeline_mode<synchronous>, transform_indices = @transform_5, window_bounds = array<i64: 1, 1>}, {pipeline_mode = #tpu.pipeline_mode<synchronous>, transform_indices = @transform_6, window_bounds = array<i64: 32, 1>}, {pipeline_mode = #tpu.pipeline_mode<synchronous>, transform_indices = @transform_7, window_bounds = array<i64: 1, 1>}, {transform_indices = @transform_8, window_bounds = array<i64: 1, 1, 1>}, {transform_indices = @transform_9, window_bounds = array<i64: 1, 1, 16>}]} {
    %c0 = arith.constant 0 : index
    %c0_0 = arith.constant 0 : index
    %c0_1 = arith.constant 0 : index
    %0 = vector.load %arg1[%c0, %c0_0, %c0_1] : memref<1x16x32xf32, #tpu.memory_space<vmem>>, vector<1x16x32xf32>
    %1 = vector.shape_cast %0 : vector<1x16x32xf32> to vector<16x32xf32>
    %c0_2 = arith.constant 0 : index
    %c0_3 = arith.constant 0 : index
    %c0_4 = arith.constant 0 : index
    %2 = vector.load %arg2[%c0_2, %c0_3, %c0_4] : memref<1x1x16xf32, #tpu.memory_space<vmem>>, vector<1x1x16xf32>
    %3 = vector.shape_cast %2 : vector<1x1x16xf32> to vector<1x16xf32>
    %4 = arith.truncf %1 : vector<16x32xf32> to vector<16x32xbf16>
    %c0_5 = arith.constant 0 : index
    %c0_6 = arith.constant 0 : index
    %5 = vector.load %arg3[%c0_5, %c0_6] : memref<32x32xbf16, #tpu.memory_space<vmem>>, vector<32x32xbf16>
    %cst = arith.constant dense<0.000000e+00> : vector<16x32xf32>
    %6 = tpu.matmul %4, %5, %cst {dimension_numbers = #tpu.dot_dimension_numbers<[1], [0], [0], [1], [0, 0, 1, 1], [], []>} : vector<16x32xbf16>, vector<32x32xbf16>, vector<16x32xf32> -> vector<16x32xf32>
    %c0_7 = arith.constant 0 : index
    %c0_8 = arith.constant 0 : index
    %7 = vector.load %arg4[%c0_7, %c0_8] : memref<1x32xf32, #tpu.memory_space<vmem>>, vector<1x32xf32>
    %8 = vector.broadcast %7 : vector<1x32xf32> to vector<16x32xf32>
    %9 = arith.addf %6, %8 : vector<16x32xf32>
    %10 = vector.extract_strided_slice %9 {offsets = [0, 0], sizes = [16, 16], strides = [1, 1]} : vector<16x32xf32> to vector<16x16xf32>
    %11 = math.tanh %10 : vector<16x16xf32>
    %12 = vector.extract_strided_slice %9 {offsets = [0, 16], sizes = [16, 16], strides = [1, 1]} : vector<16x32xf32> to vector<16x16xf32>
    %13 = arith.negf %12 : vector<16x16xf32>
    %14 = math.exp %13 : vector<16x16xf32>
    %cst_9 = arith.constant 1.000000e+00 : f32
    %15 = vector.broadcast %cst_9 : f32 to vector<16x16xf32>
    %16 = arith.addf %15, %14 : vector<16x16xf32>
    %17 = arith.divf %15, %16 : vector<16x16xf32>
    %18 = arith.mulf %11, %17 : vector<16x16xf32>
    %c0_10 = arith.constant 0 : index
    %c0_11 = arith.constant 0 : index
    %19 = vector.load %arg5[%c0_10, %c0_11] : memref<1x16xf32, #tpu.memory_space<vmem>>, vector<1x16xf32>
    %cst_12 = arith.constant dense<0.000000e+00> : vector<1x16xf32>
    %20 = tpu.matmul %19, %18, %cst_12 {dimension_numbers = #tpu.dot_dimension_numbers<[1], [1], [0], [0], [0, 0, 1, 0], [], []>} : vector<1x16xf32>, vector<16x16xf32>, vector<1x16xf32> -> vector<1x16xf32>
    %c0_13 = arith.constant 0 : index
    %c0_14 = arith.constant 0 : index
    %21 = vector.load %arg6[%c0_13, %c0_14] : memref<1x1xf32, #tpu.memory_space<vmem>>, vector<1x1xf32>
    %22 = vector.broadcast %21 : vector<1x1xf32> to vector<1x16xf32>
    %23 = arith.addf %20, %22 : vector<1x16xf32>
    %cst_15 = arith.constant 0.000000e+00 : f32
    %24 = vector.broadcast %cst_15 : f32 to vector<1x16xf32>
    %25 = arith.cmpf ogt, %3, %24 : vector<1x16xf32>
    %cst_16 = arith.constant -1.000000e+30 : f32
    %26 = vector.broadcast %cst_16 : f32 to vector<1x16xf32>
    %27 = arith.select %25, %23, %26 : vector<1x16xi1>, vector<1x16xf32>
    %cst_17 = arith.constant dense<0xFF800000> : vector<1xf32>
    %28 = vector.multi_reduction <maximumf>, %27, %cst_17 [1] : vector<1x16xf32> to vector<1xf32>
    %29 = vector.shape_cast %28 : vector<1xf32> to vector<1x1xf32>
    %30 = vector.broadcast %29 : vector<1x1xf32> to vector<1x16xf32>
    %31 = arith.subf %27, %30 : vector<1x16xf32>
    %32 = math.exp %31 : vector<1x16xf32>
    %cst_18 = arith.constant 0.000000e+00 : f32
    %33 = vector.broadcast %cst_18 : f32 to vector<1x16xf32>
    %34 = arith.select %25, %32, %33 : vector<1x16xi1>, vector<1x16xf32>
    %cst_19 = arith.constant dense<0.000000e+00> : vector<1xf32>
    %35 = vector.multi_reduction <add>, %34, %cst_19 [1] : vector<1x16xf32> to vector<1xf32>
    %36 = vector.shape_cast %35 : vector<1xf32> to vector<1x1xf32>
    %cst_20 = arith.constant 9.99999968E-21 : f32
    %37 = vector.broadcast %cst_20 : f32 to vector<1x1xf32>
    %38 = arith.maximumf %36, %37 : vector<1x1xf32>
    %39 = tpu.reciprocal %38 {approx = true} : vector<1x1xf32> -> vector<1x1xf32>
    %40 = vector.broadcast %39 : vector<1x1xf32> to vector<1x16xf32>
    %41 = arith.mulf %34, %40 : vector<1x16xf32>
    %cst_21 = arith.constant dense<0.000000e+00> : vector<1x32xf32>
    %42 = tpu.matmul %41, %1, %cst_21 {dimension_numbers = #tpu.dot_dimension_numbers<[1], [0], [0], [1], [0, 0, 1, 1], [], []>} : vector<1x16xf32>, vector<16x32xf32>, vector<1x32xf32> -> vector<1x32xf32>
    %c0_22 = arith.constant 0 : index
    %c0_23 = arith.constant 0 : index
    %43 = vector.load %arg7[%c0_22, %c0_23] : memref<32x1xf32, #tpu.memory_space<vmem>>, vector<32x1xf32>
    %cst_24 = arith.constant dense<0.000000e+00> : vector<1x1xf32>
    %44 = tpu.matmul %42, %43, %cst_24 {dimension_numbers = #tpu.dot_dimension_numbers<[1], [0], [0], [1], [0, 0, 1, 1], [], []>} : vector<1x32xf32>, vector<32x1xf32>, vector<1x1xf32> -> vector<1x1xf32>
    %c0_25 = arith.constant 0 : index
    %c0_26 = arith.constant 0 : index
    %45 = vector.load %arg8[%c0_25, %c0_26] : memref<1x1xf32, #tpu.memory_space<vmem>>, vector<1x1xf32>
    %46 = arith.addf %44, %45 : vector<1x1xf32>
    %c0_27 = arith.constant 0 : index
    %c0_28 = arith.constant 0 : index
    %c0_29 = arith.constant 0 : index
    %47 = vector.load %arg9[%c0_27, %c0_28, %c0_29] : memref<1x1x1xf32, #tpu.memory_space<vmem>>, vector<1x1x1xf32>
    %48 = vector.shape_cast %47 : vector<1x1x1xf32> to vector<1x1xf32>
    %49 = vector.shape_cast %46 : vector<1x1xf32> to vector<1x1x1xf32>
    tpu.vector_store %arg9[%c0_27, %c0_28, %c0_29], %49 {strides = array<i32>} : memref<1x1x1xf32, #tpu.memory_space<vmem>>, vector<1x1x1xf32>,
    %c0_30 = arith.constant 0 : index
    %c0_31 = arith.constant 0 : index
    %c0_32 = arith.constant 0 : index
    %50 = vector.load %arg10[%c0_30, %c0_31, %c0_32] : memref<1x1x16xf32, #tpu.memory_space<vmem>>, vector<1x1x16xf32>
    %51 = vector.shape_cast %50 : vector<1x1x16xf32> to vector<1x16xf32>
    %52 = vector.shape_cast %41 : vector<1x16xf32> to vector<1x1x16xf32>
    tpu.vector_store %arg10[%c0_30, %c0_31, %c0_32], %52 {strides = array<i32>} : memref<1x1x16xf32, #tpu.memory_space<vmem>>, vector<1x1x16xf32>,
    return
  }
  func.func @transform_0(%arg0: i32) -> (i32, i32, i32) {
    %c0_i32 = arith.constant 0 : i32
    %c0_i32_0 = arith.constant 0 : i32
    %c0_i32_1 = arith.constant 0 : i32
    return %arg0, %c0_i32, %c0_i32_0 : i32, i32, i32
  }
  func.func @transform_1(%arg0: i32) -> (i32, i32, i32) {
    %c0_i32 = arith.constant 0 : i32
    %c0_i32_0 = arith.constant 0 : i32
    %c0_i32_1 = arith.constant 0 : i32
    return %arg0, %c0_i32, %c0_i32_0 : i32, i32, i32
  }
  func.func @transform_2(%arg0: i32) -> (i32, i32) {
    %c0_i32 = arith.constant 0 : i32
    %c0_i32_0 = arith.constant 0 : i32
    %c0_i32_1 = arith.constant 0 : i32
    return %c0_i32, %c0_i32_0 : i32, i32
  }
  func.func @transform_3(%arg0: i32) -> (i32, i32) {
    %c0_i32 = arith.constant 0 : i32
    %c0_i32_0 = arith.constant 0 : i32
    %c0_i32_1 = arith.constant 0 : i32
    return %c0_i32, %c0_i32_0 : i32, i32
  }
  func.func @transform_4(%arg0: i32) -> (i32, i32) {
    %c0_i32 = arith.constant 0 : i32
    %c0_i32_0 = arith.constant 0 : i32
    %c0_i32_1 = arith.constant 0 : i32
    return %c0_i32, %c0_i32_0 : i32, i32
  }
  func.func @transform_5(%arg0: i32) -> (i32, i32) {
    %c0_i32 = arith.constant 0 : i32
    %c0_i32_0 = arith.constant 0 : i32
    %c0_i32_1 = arith.constant 0 : i32
    return %c0_i32, %c0_i32_0 : i32, i32
  }
  func.func @transform_6(%arg0: i32) -> (i32, i32) {
    %c0_i32 = arith.constant 0 : i32
    %c0_i32_0 = arith.constant 0 : i32
    %c0_i32_1 = arith.constant 0 : i32
    return %c0_i32, %c0_i32_0 : i32, i32
  }
  func.func @transform_7(%arg0: i32) -> (i32, i32) {
    %c0_i32 = arith.constant 0 : i32
    %c0_i32_0 = arith.constant 0 : i32
    %c0_i32_1 = arith.constant 0 : i32
    return %c0_i32, %c0_i32_0 : i32, i32
  }
  func.func @transform_8(%arg0: i32) -> (i32, i32, i32) {
    %c0_i32 = arith.constant 0 : i32
    %c0_i32_0 = arith.constant 0 : i32
    %c0_i32_1 = arith.constant 0 : i32
    return %arg0, %c0_i32, %c0_i32_0 : i32, i32, i32
  }
  func.func @transform_9(%arg0: i32) -> (i32, i32, i32) {
    %c0_i32 = arith.constant 0 : i32
    %c0_i32_0 = arith.constant 0 : i32
    %c0_i32_1 = arith.constant 0 : i32
    return %arg0, %c0_i32, %c0_i32_0 : i32, i32, i32
  }
}

</mosaic_0001>

<bundles_post_ra>
// kernel: _lambda_.3
= control target key start
LH: loop header
LB: loop body
LE: loop exit
PB: predicated region body
PF: predicated region fallthrough
CT: control target
= control target key end

     0   :  { %vm58_vm0 = vcmask 1045504   ;;  %vm51_vm1 = vcmask 228352   ;;  %vm115_vm2 = vcmask 261120   ;;  %s195_s1 = inlined_call_operand.vmem [shape: bf16[28,32], index: 1, kind: input, shape index: {}]   ;;  %s196_s0 = inlined_call_operand.vmem [shape: bf16[32,28], index: 0, kind: input, shape index: {}]   ;;  %s197_s2 = inlined_call_operand.vmem [shape: f32[1,32], index: 2, kind: input, shape index: {}]   ;;  %s198_s3 = inlined_call_operand.vmem [shape: f32[32,32], index: 3, kind: output, shape index: {}]  }
   0x1   :  { %v144_v0 = vld [vmem:[%s195_s1 + $0x8] sm:$0x3f]   ;;  %v145_v1 = vld [vmem:[%s195_s1] sm:$0xff]  }
   0x2   :  { %143 = vmatprep.subr.msk.bf16.mxu0 %vm58_vm0, %v144_v0  ;;  %v60_v2 = vsel %vm58_vm0, %v144_v0, 0  ;;  %v146_v3 = vld [vmem:[%s196_s0] sm:$0xff]   ;;  %v147_v4 = vld [vmem:[%s196_s0 + $0x8] sm:$0xff]  }
   0x3   :  { %136 = vmatpush3.bf16.msra.mxu0 %v60_v2  ;;  %139 = vmatprep.mubr.msk.bf16.mxu0 %vm51_vm1, %v146_v3  ;;  %v124_v5 = vld [vmem:[%s197_s2] ss:$0 sm:$0xff] }
   0x4   :  { %137 = vmatprep.subr.bf16.mxu0 %v145_v1 }
   0x7   :  { %138 = vmatpush3.bf16.msra.mxu0 %v145_v1 }
   0xa   :  { %140 = vmatmul.mubr.msk.bf16.vlgmr.msra.gmra.mxu0 %vm51_vm1, %v147_v4 }
  0xca   :  { %v141_v6 = vpop.f32.mrf.mxu0 }
  0xcb   :  { %v105_v7 = vadd.f32 %v141_v6, %v124_v5 }
  0xcc   :  { %v96_v8 = vpop.f32.mrf.mxu0 }
  0xcd   :  { %v113_v9 = vmax.f32 %v105_v7, 0.0  ;;  %v97_v10 = vadd.f32 %v124_v5, %v96_v8 }
  0xce   :  { %v142_v11 = vpop.f32.mrf.mxu0 }
  0xcf   :  { %118 = vst.msk [vmem:[%s198_s3 + $0x10] sm:$0xff] %vm115_vm2, %v113_v9  ;;  %v111_v12 = vmax.f32 %v97_v10, 0.0  ;;  %v108_v13 = vadd.f32 %v142_v11, %v124_v5 }
  0xd0   :  { %v99_v14 = vpop.f32.mrf.mxu0 }
  0xd1   :  { %116 = vst.msk [vmem:[%s198_s3] sm:$0xff] %vm115_vm2, %v111_v12  ;;  %v114_v15 = vmax.f32 %v108_v13, 0.0  ;;  %v100_v16 = vadd.f32 %v124_v5, %v99_v14 }
  0xd3   :  { %119 = vst.msk [vmem:[%s198_s3 + $0x18] sm:$0xff] %vm115_vm2, %v114_v15  ;;  %v112_v17 = vmax.f32 %v100_v16, 0.0 }
  0xd5   :  { %117 = vst.msk [vmem:[%s198_s3 + $0x8] sm:$0xff] %vm115_vm2, %v112_v17 }

// kernel: _lambda_.5
= control target key start
LH: loop header
LB: loop body
LE: loop exit
PB: predicated region body
PF: predicated region fallthrough
CT: control target
= control target key end

     0   :  { %s1220_s0 = inlined_call_operand.vmem [shape: f32[2,16,32], index: 0, kind: input, shape index: {}]   ;;  %s1221_s1 = inlined_call_operand.vmem [shape: f32[2,1,16], index: 1, kind: input, shape index: {}]   ;;  %s1222_s2 = inlined_call_operand.vmem [shape: bf16[32,32], index: 2, kind: input, shape index: {}]   ;;  %s1223_s3 = inlined_call_operand.vmem [shape: f32[1,32], index: 3, kind: input, shape index: {}]   ;;  %s1224_s4 = inlined_call_operand.vmem [shape: f32[1,16], index: 4, kind: input, shape index: {}]   ;;  %s1225_s5 = inlined_call_operand.<no memory space> [shape: f32[1,1], index: 5, kind: input, shape index: {}, may-alias: {5,7}]   ;;  %s1226_s6 = inlined_call_operand.vmem [shape: f32[32,1], index: 6, kind: input, shape index: {}]   ;;  %s1227_s8 = inlined_call_operand.vmem [shape: f32[2,1,1], index: 8, kind: output, shape index: {0}]   ;;  %s1228_s9 = inlined_call_operand.hbm [shape: f32[2,1,16], index: 9, kind: output, shape index: {1}]   ;;  %s1229_s7 = inlined_call_operand.<no memory space> [shape: f32[1,1], index: 7, kind: input, shape index: {}, may-alias: {5,7}]  }
   0x1   :  { %v15_v0 = vstv %s1225_s5  ;;  %v17_v1 = vstv %s1229_s7 }
   0x2   :  { %16 = vst [vmem:[#allocation2] sm:$0x1] %v15_v0  ;;  %18 = vst [vmem:[#allocation3] sm:$0x1] %v17_v1 }
   0x3   :  { %19 = vsyncpa [#allocation5], 0 }
   0x4   :  { %21 = vsyncpa [#allocation5 + $0x1], 0  ;;  %s1071_s13 = smov 0   ;;  %s1073_s14 = smov 0  }
   0x5   :  { %s1075_s15 = smov 0   ;;  %s1077_s16 = smov 0  }
   0x6 LB: > { %s1092_s5 = sadd.s32 4294967295, %s1008_s16   ;;  %s817_s7 = sadd.s32 4294967294, %s1008_s16   ;;  %s1008_s16 = sphi %s1077_s16, %s1235_s16   ;;  %s1004_s15 = sphi %s1075_s15, %s1234_s15   ;;  %s1000_s14 = sphi %s1073_s14, %s1233_s14   ;;  %s996_s13 = sphi %s1071_s13, %s1232_s13  }
   0x7   : > { %s1096_s17 = sadd.s32 1, %s1008_s16   ;;  %s238_s18 = sadd.s32 1, %s1004_s15 }
   0x8   : > { %s235_s19 = ssub.s32 %s1008_s16, %s1096_s17  ;;  %p248_p0 = scmp.ne.s32.totalorder %s1004_s15, %s1000_s14 }
   0x9   : > { %p236_p1 = scmp.eq.s32.totalorder %s235_s19, 0  ;;  %p249_p2 = scmp.eq.s32.totalorder %s1092_s5, 1 }
   0xa   : > { %p254_p3 = scmp.ne.s32.totalorder %s1000_s14, %s996_s13  ;;  %p255_p4 = scmp.eq.s32.totalorder %s817_s7, 1 }
   0xb   : > { %s1107_s20 = scalar_select %p236_p1, %s1004_s15, %s238_s18  }
   0xc   : > { %p1109_p5 = por %p249_p2, %p248_p0  ;;  %p1113_p6 = por %p255_p4, %p254_p3 }
   0xd   : > { %p820_p7 = scmp.ge.s32.totalorder %s1008_s16, 1  ;;  %p305_p8 = scmp.lt.s32.totalorder %s1008_s16, 3 }
   0xf   : > { %p306_p9 = pnand %p820_p7, %p305_p8 }
  0x10   : > { %p346_p10 = scmp.lt.s32.totalorder (!%p306_p9), %s1092_s5, 1  ;;  %s1013_s7 = smov (!%p306_p9), 112  }
  0x11   : > { %309 = sbr.rel (%p306_p9) target bundleno = 1286 (0x506), region = 52  ;;  %s344_s18 = sand.u32 (!%p306_p9), 1, %s1000_s14  }
  0x12   : > { %s345_s19 = scalar_lea.vmem (!%p306_p9), [#allocation4], %s344_s18  ;;  %s834_s23 = sshll.u32 (!%p306_p9), %s1092_s5, 4 }
  0x13   : > { %s734_s24 = sshll.u32 (!%p306_p9), %s345_s19, 4  ;;  %s719_s29 = scalar_lea.sflag (!%p306_p9), [#allocation5], %s344_s18  ;;  %s735_s24 = int_to_ptr.vmem [resolvable:$true] %s734_s24 }
  0x14   : > { %s948_s30 = scalar_lea.vmem (!%p306_p9), %s735_s24, 16 }
  0x15   : > { %p949_p11 = scmp.ne.s32.totalorder (!%p306_p9), %s735_s24, %s948_s30 }
  0x16   : > { %v930_v2 = vld [vmem:[%s1222_s2 + $0x8] sm:$0xff]   ;;  %v1010_v3 = vmov 0.0   ;;  %v931_v4 = vld [vmem:[%s1222_s2] sm:$0xff]   ;;  %vm1011_vm0 = vmmov 0   ;;  %s1134_s27 = scalar_select %p346_p10, %s1092_s5, 1  ;;  %vm385_vm1 = vcmask 261120   ;;  %v461_v32 = vlaneseq }
  0x17   : > { %852 = vmatprep.subr.bf16.mxu0 %v1010_v3  ;;  %860 = vmatprep.subr.mxu1 %v1010_v3  ;;  %v823_v8 = vld [vmem:[%s1223_s3] ss:$0 sm:$0xff]  ;;  %v1012_v22 = vmov 0   ;;  %vm465_vm2 = vcmask 130048   ;;  %vm547_vm4 = vcmask 122880   ;;  %v637_v49 = vld [vmem:[%s1226_s6 + $0x18] sm:$0xff]  ;;  %p950_p12 = pnand %p949_p11, %p1109_p5 }
  0x18   : > { %853 = vmatpush3.bf16.msra.mxu0 %v930_v2  ;;  %856 = vmatprep.mubr.msk.bf16.mxu0 %vm1011_vm0, %v1010_v3  ;;  %s837_s28 = sshll.u32 %s1134_s27, 4  ;;  %v455_v21 = vld [vmem:[#allocation2] sm:$0x1]  ;;  %v462_v33 = vshrl.u32 %v461_v32, 7  ;;  %s353_s25 = scalar_lea.vmem %s1221_s1, %s1134_s27  ;;  %v636_v50 = vld [vmem:[%s1226_s6 + $0x10] sm:$0xff]  ;;  %v635_v51 = vld [vmem:[%s1226_s6 + $0x8] sm:$0xff] }
  0x19   : > { %854 = vmatprep.subr.bf16.mxu0 %v1010_v3  ;;  %864 = vmatprep.mubr.msk.f32.mxu1 %vm1011_vm0, %v1010_v3  ;;  %s350_s10 = scalar_lea.vmem %s1220_s0, %s837_s28  ;;  %v454_v31 = vld [vmem:[%s1224_s4] sm:$0x1]  ;;  %s732_s28 = scalar_lea.hbm %s1228_s9, %s834_s23 }
  0x1a   : > { %v358_v5 = vld [vmem:[%s350_s10] sm:$0xff]  ;;  %v359_v6 = vld [vmem:[%s350_s10 + $0x8] sm:$0xff]  ;;  %928 = vset.pattern.permute.xlu1 %v1012_v22  ;;  %929 = vset.pattern.permute.xlu0 %v1012_v22  ;;  %v463_v34 = vsub.s32 0, %v462_v33  ;;  %p951_p13 = pneg %p950_p12  ;;  %s1014_s10 = smov [#allocation4]  }
  0x1b   : > { %v361_v7 = vpack.c.bf16 %v359_v6, %v358_v5  ;;  %458 = vperm.xlu1 %928, %v455_v21   ;;  %v360_v37 = vld [vmem:[%s353_s25] sm:$0x1]  ;;  %s952_s11 = sshll.u32 %s1014_s10, 4  ;;  %s953_s11 = int_to_ptr.vmem [resolvable:$false] %s952_s11 }
  0x1c   : > { %855 = vmatpush3.bf16.msra.mxu0 %v931_v4  ;;  %vm545_vm3 = vcmp.gt.f32.partialorder %v360_v37, 0.0  ;;  %v634_v52 = vld [vmem:[%s1226_s6] sm:$0xff]  ;;  %s954_s12 = scalar_lea.vmem %s953_s11, 32  ;;  %p955_p0 = scmp.lt.s32.totalorder %s735_s24, %s953_s11 }
  0x1d   : > { %874 = vmatprep.subr.mxu0 %v1010_v3  ;;  %p956_p1 = scmp.lt.s32.totalorder %s954_s12, %s948_s30 }
  0x1f   : > { %857 = vmatmul.mubr.msk.bf16.vlgmr.msra.gmra.mxu0 %vm385_vm1, %v361_v7  ;;  %p957_p2 = por %p956_p1, %p955_p0 }
  0x20   : > { %882 = vmatprep.mubr.msk.f32.mxu0 %vm1011_vm0, %v1010_v3  ;;  %875 = vmatpush3.msra.mxu0 %v637_v49 }
  0x21   : > { %876 = vmatprep.subr.mxu0 %v1010_v3  ;;  %p958_p3 = pnand %p957_p2, %p951_p13 }
  0x22   : > { %877 = vmatpush3.msra.mxu0 %v636_v50 }
  0x23   : > { %878 = vmatprep.subr.mxu0 %v1010_v3 }
  0x24   : > { %879 = vmatpush3.msra.mxu0 %v635_v51 }
  0x25   : > { %880 = vmatprep.subr.mxu0 %v1010_v3 }
  0x26   : > { %881 = vmatpush3.msra.mxu0 %v634_v52 }
  0x96   : > { %v459_v35 = vpop.permute.xlu1 %458 }
  0x97   : > { %v464_v36 = vrot.slane %v459_v35, %v463_v34 }
  0xdf   : > { %v423_v9 = vpop.f32.mrf.mxu0 }
  0xe0   : > { %v424_v10 = vadd.f32 %v823_v8, %v423_v9 }
  0xe1   : > { %v858_v11 = vpop.f32.mrf.mxu0 }
  0xe2   : > { %v827_v12 = vmul.f32 -1.442695, %v424_v10 }
  0xe3   : > { %v426_v13 = vpop.f32.mrf.mxu0 }
  0xe4   : > { %v427_v14 = vadd.f32 %v823_v8, %v426_v13  ;;  %932 = vpow2.f32 %v827_v12 }
  0xe5   : > { %v859_v15 = vpop.f32.mrf.mxu0 }
  0xe6   : > { %v828_v16 = vmul.f32 -1.442695, %v427_v14 }
  0xe8   : > { %934 = vpow2.f32 %v828_v16 }
  0xf1   : > { %v933_v17 = vpop.eup %932 }
  0xf2   : > { %v438_v20 = vadd.f32 1.0, %v933_v17 }
  0xf5   : > { %v935_v18 = vpop.eup %934 }
  0xf6   : > { %v439_v19 = vadd.f32 1.0, %v935_v18 }
  0xf8   : > { %936 = vrcp.f32 %v439_v19 }
  0xf9   : > { %938 = vrcp.f32 %v438_v20 }
  0xfa   : > { %940 = vtanh.f32 %v427_v14 }
  0xfb   : > { %942 = vtanh.f32 %v424_v10 }
 0x105   : > { %v937_v23 = vpop.eup %936 }
 0x106   : > { %448 = vrot.lane.b32.xlu0 %v937_v23, %s1013_s7  ;;  %v939_v24 = vpop.eup %938 }
 0x107   : > { %v941_v25 = vpop.eup %940 }
 0x108   : > { %v943_v28 = vpop.eup %942 }
 0x10a   : > { %446 = vrot.lane.b32.xlu0 %v939_v24, %s1013_s7 }
 0x178   : > { %v449_v26 = vpop.permute.xlu0 %448 }
 0x179   : > { %v453_v27 = vmul.f32 %v941_v25, %v449_v26 }
 0x17b   : > { %861 = vmatpush3.xpose.msk.msra.mxu1 %vm465_vm2, %v453_v27 }
 0x17c   : > { %v447_v29 = vpop.permute.xlu0 %446  ;;  %862 = vmatprep.subr.mxu1 %v1010_v3 }
 0x17d   : > { %v452_v30 = vmul.f32 %v943_v28, %v447_v29 }
 0x17f   : > { %863 = vmatpush3.xpose.msk.msra.mxu1 %vm465_vm2, %v452_v30 }
 0x180   : > { %867 = vmatprep.subr.mxu1 %v1010_v3 }
 0x182   : > { %865 = vmatmul.mubr.msk.f32.vlgmr.msra.gmra.mxu1 %vm465_vm2, %v454_v31 }
 0x183   : > { %868 = vmatpush3.msra.mxu1 %v359_v6  ;;  %871 = vmatprep.mubr.msk.f32.mxu1 %vm1011_vm0, %v1010_v3 }
 0x184   : > { %869 = vmatprep.subr.mxu1 %v1010_v3 }
 0x185   : > { %870 = vmatpush3.msra.mxu1 %v358_v5 }
 0x242   : > { %v541_v38 = vpop.f32.mrf.mxu1 }
 0x243   : > { %v542_v39 = vadd.f32 %v541_v38, %v464_v36 }
 0x244   : > { %v866_v40 = vpop.f32.mrf.mxu1 }
 0x245   : > { %v546_v41 = vsel %vm545_vm3, %v542_v39, -1e+30 }
 0x246   : > { %v548_v42 = vsel %vm547_vm4, %v546_v41, -inf }
 0x247   : > { %549 = vmax.xlane.f32.xlu1 %v548_v42 }
 0x2d0   : > { %v550_v43 = vpop.xlane.xlu1 %549 }
 0x2d1   : > { %v551_v44 = vsub.f32 %v546_v41, %v550_v43 }
 0x2d3   : > { %v552_v45 = vmul.f32 1.442695, %v551_v44 }
 0x2d5   : > { %944 = vpow2.f32 %v552_v45 }
 0x2e2   : > { %v945_v46 = vpop.eup %944 }
 0x2e3   : > { %v554_v47 = vsel %vm545_vm3, %v945_v46, 0.0 }
 0x2e4   : > { %v555_v48 = vsel %vm547_vm4, %v554_v47, 0.0 }
 0x2e5   : > { %556 = vadd.xlane.f32.xlu0 %v555_v48 }
 0x36e   : > { %v557_v53 = vpop.xlane.xlu0 %556 }
 0x36f   : > { %v558_v54 = vmax.f32 %v557_v53, 1e-20 }
 0x371   : > { %946 = vrcp.f32 %v558_v54 }
 0x37e   : > { %v947_v55 = vpop.eup %946 }
 0x37f   : > { %v560_v56 = vmul.f32 %v947_v55, %v554_v47 }
 0x381   : > { %872 = vmatmul.mubr.msk.f32.vlgmr.msra.gmra.mxu1 %vm465_vm2, %v560_v56  ;;  %714 = vst.msk [vmem:[%s345_s19] sm:$0x1] %vm547_vm4, %v560_v56 }
 0x441   : > { %v630_v57 = vpop.f32.mrf.mxu1 }
 0x442   : > { %883 = vmatmul.mubr.msk.f32.vlgmr.msra.gmra.mxu0 %vm385_vm1, %v630_v57 }
 0x443   : > { %v873_v58 = vpop.f32.mrf.mxu1 }
 0x444   : > { %961 = shalt.err (!%p958_p3)
}
 0x445   : > { %s962_s5 = scalar_lea.hbm %s732_s28, 16  ;;  %s966_s19 = scalar_lea.hbm %s1228_s9, 32 }
 0x446   : > { %p963_p4 = scmp.ne.s32.totalorder %s732_s28, %s962_s5  ;;  %p967_p9 = scmp.lt.s32.totalorder %s732_s28, %s1228_s9 }
 0x447   : > { %p968_p10 = scmp.lt.s32.totalorder %s966_s19, %s962_s5 }
 0x448   : > { %p964_p7 = pnand %p963_p4, %p1109_p5 }
 0x449   : > { %p969_p11 = por %p968_p10, %p967_p9 }
 0x44a   : > { %p965_p8 = pneg %p964_p7 }
 0x44c   : > { %p970_p12 = pnand %p969_p11, %p965_p8 }
 0x44e   : > { %973 = shalt.err (!%p970_p12)
}
 0x44f   : > { %885 = dma.vmem_to_hbm [thread:$0]  (%p1109_p5), %s735_s24, 16, %s732_s28, %s719_s29   ;;  %v638_v59 = vld [vmem:[#allocation3] sm:$0x1]  ;;  %vm712_vm5 = vcmask 0  }
 0x450   : > { %s356_s10 = scalar_lea.vmem %s1227_s8, %s1134_s27 }
 0x502   : > { %v708_v60 = vpop.f32.mrf.mxu0 }
 0x503   : > { %v709_v61 = vadd.f32 %v708_v60, %v638_v59 }
 0x504   : > { %v884_v62 = vpop.f32.mrf.mxu0 }
 0x505   : > { %713 = vst.msk [vmem:[%s356_s10] sm:$0x1] %vm712_vm5, %v709_v61 }
 0x506 PF: > { %p891_p13 = scmp.ge.s32.totalorder %s1008_s16, 2  ;;  %s752_s11 = sand.u32 1, %s996_s13  }
 0x507   : > { %s753_s21 = scalar_lea.sflag [#allocation5], %s752_s11 }
 0x508   : > { %p888_p0 = pnand %p891_p13, %p1113_p6 }
 0x50a   : > { %p889_p1 = pneg %p888_p0 }
 0x50c   : > { %991 = dma.done.wait (%p889_p1), %s753_s21, 16  }
 0x50d   : > { %993 = vsyncadd (%p889_p1), %s753_s21, 4294967280  ;;  %p24_p5 = scmp.ge.s32.totalorder %s1096_s17, 4   ;;  %s1232_s13 = smov %s1000_s14 }
 0x50e   : > { %s1233_s14 = smov %s1004_s15  ;;  %s1234_s15 = smov %s1107_s20 }
 0x50f   : > { %s1235_s16 = smov %s1096_s17  ;;  %26 = sbr.rel (!%p24_p5) target bundleno = 6 (0x6), region = 102 }
 0x514   :  { %757 = vsyncpa [#allocation5], 1 }
 0x515   :  { %759 = vsyncpa [#allocation5 + $0x1], 1 }

// kernel: _lambda_.4
= control target key start
LH: loop header
LB: loop body
LE: loop exit
PB: predicated region body
PF: predicated region fallthrough
CT: control target
= control target key end

     0   :  { %s915_s18 = smov 0   ;;  %s1030_s0 = inlined_call_operand.vmem [shape: f32[2,16,32], index: 0, kind: input, shape index: {}]   ;;  %s1031_s1 = inlined_call_operand.vmem [shape: bf16[3,32,64], index: 1, kind: input, shape index: {}]   ;;  %s1032_s2 = inlined_call_operand.vmem [shape: f32[1,64], index: 2, kind: input, shape index: {}]   ;;  %s1033_s3 = inlined_call_operand.vmem [shape: bf16[3,32,32], index: 3, kind: input, shape index: {}]   ;;  %s1034_s4 = inlined_call_operand.vmem [shape: f32[1,32], index: 4, kind: input, shape index: {}]   ;;  %s1035_s5 = inlined_call_operand.vmem [shape: f32[2,16,32], index: 5, kind: output, shape index: {}]  }
   0x1 LB: > { %s726_s19 = sadd.s32 4294967295, %s880_s18   ;;  %p730_p0 = scmp.ge.s32.totalorder %s880_s18, 1  ;;  %s880_s18 = sphi %s915_s18, %s15_s18  }
   0x2   : > { %p187_p1 = scmp.lt.s32.totalorder %s880_s18, 3 }
   0x4   : > { %p188_p2 = pnand %p730_p0, %p187_p1 }
   0x5   : > { %p215_p3 = scmp.lt.s32.totalorder (!%p188_p2), %s726_s19, 1  ;;  %s884_s27 = smov (!%p188_p2), 96  }
   0x6   : > { %191 = sbr.rel (%p188_p2) target bundleno = 463 (0x1cf), region = 40 }
   0xb   : > { %v854_v0 = vld [vmem:[%s1031_s1 + $0x18] sm:$0xff]   ;;  %v882_v1 = vmov 0.0   ;;  %v855_v2 = vld [vmem:[%s1031_s1 + $0x8] sm:$0xff]   ;;  %v856_v3 = vld [vmem:[%s1031_s1 + $0x10] sm:$0xff]   ;;  %vm883_vm0 = vmmov 0   ;;  %vm228_vm1 = vcmask 261120  }
   0xc   : > { %795 = vmatprep.subr.bf16.mxu0 %v882_v1  ;;  %803 = vmatprep.subr.bf16.mxu1 %v882_v1  ;;  %v857_v4 = vld [vmem:[%s1031_s1] sm:$0xff]   ;;  %s1037_s19 = smov (!%p215_p3, %s726_s19), 1  ;;  %229 = vst.msk [vmem:[#allocation2] sm:$0xff] %vm228_vm1, %v882_v1  ;;  %230 = vst.msk [vmem:[#allocation2 + $0x8] sm:$0xff] %vm228_vm1, %v882_v1  ;;  %vm231_vm2 = vcmask 254976   ;;  %v858_v7 = vld [vmem:[%s1031_s1 + $0x28] sm:$0xff]  }
   0xd   : > { %796 = vmatpush3.bf16.msra.mxu0 %v854_v0  ;;  %799 = vmatprep.mubr.msk.bf16.mxu0 %vm883_vm0, %v882_v1  ;;  %232 = vst.msk [vmem:[#allocation2 + $0x10] sm:$0x3] %vm231_vm2, %v882_v1  ;;  %s775_s28 = sshll.u32 %s1037_s19, 4  ;;  %v859_v14 = vld [vmem:[%s1031_s1 + $0x20] sm:$0xff]   ;;  %v860_v18 = vld [vmem:[%s1033_s3 + $0x18] sm:$0xff]   ;;  %v861_v19 = vld [vmem:[%s1033_s3 + $0x8] sm:$0xff]  }
   0xe   : > { %804 = vmatpush3.bf16.msra.mxu1 %v855_v2  ;;  %797 = vmatprep.subr.bf16.mxu0 %v882_v1  ;;  %s219_s6 = scalar_lea.vmem %s1030_s0, %s775_s28  ;;  %v862_v20 = vld [vmem:[%s1033_s3 + $0x10] sm:$0xff]   ;;  %v863_v21 = vld [vmem:[%s1033_s3] sm:$0xff]   ;;  %v864_v46 = vld [vmem:[%s1033_s3 + $0x28] sm:$0xff]   ;;  %s224_s8 = scalar_lea.vmem %s1035_s5, %s775_s28 }
   0xf   : > { %805 = vmatprep.subr.bf16.mxu1 %v882_v1  ;;  %807 = vmatprep.mubr.msk.bf16.mxu1 %vm883_vm0, %v882_v1  ;;  %v957_v5 = vld [vmem:[%s219_s6] sm:$0xff]  ;;  %v959_v6 = vld [vmem:[%s219_s6 + $0x8] sm:$0xff] }
  0x10   : > { %233 = vst.msk [vmem:[#allocation2 + $0x1] sm:$0xff] %vm228_vm1, %v957_v5  ;;  %234 = vst.msk [vmem:[#allocation2 + $0x9] sm:$0xff] %vm228_vm1, %v959_v6  ;;  %v752_v32 = vld [vmem:[%s1032_s2] ss:$0 sm:$0xff] }
  0x11   : > { %798 = vmatpush3.bf16.msra.mxu0 %v856_v3  ;;  %v865_v54 = vld [vmem:[%s1033_s3 + $0x20] sm:$0xff]  }
  0x12   : > { %806 = vmatpush3.bf16.msra.mxu1 %v857_v4  ;;  %811 = vmatprep.subr.bf16.mxu0 %v882_v1 }
  0x13   : > { %819 = vmatprep.subr.bf16.mxu1 %v882_v1 }
  0x17   : > { %v238_v8 = vld [vmem:[#allocation2 + $0x1] sm:$0xff]  ;;  %v239_v9 = vld [vmem:[#allocation2 + $0x9] sm:$0xff] }
  0x18   : > { %v235_v10 = vld [vmem:[#allocation2] sm:$0xff]  ;;  %v240_v11 = vpack.c.bf16 %v239_v9, %v238_v8  ;;  %v236_v12 = vld [vmem:[#allocation2 + $0x8] sm:$0xff] }
  0x19   : > { %v237_v13 = vpack.c.bf16 %v236_v12, %v235_v10  ;;  %v241_v15 = vld [vmem:[#allocation2 + $0x2] sm:$0xff]  ;;  %v242_v16 = vld [vmem:[#allocation2 + $0xa] sm:$0xff]  ;;  %v770_v10 = vld [vmem:[%s1034_s4] ss:$0 sm:$0xff] }
  0x1a   : > { %800 = vmatmul.mubr.msk.bf16.vlgmr.msra.gmra.mxu0 %vm228_vm1, %v240_v11  ;;  %v243_v17 = vpack.c.bf16 %v242_v16, %v241_v15 }
  0x1b   : > { %808 = vmatmul.mubr.msk.bf16.vlgmr.msra.gmra.mxu1 %vm228_vm1, %v237_v13  ;;  %812 = vmatpush3.bf16.msra.mxu0 %v858_v7 }
  0x1c   : > { %813 = vmatprep.subr.bf16.mxu0 %v882_v1  ;;  %815 = vmatprep.mubr.msk.bf16.mxu0 %vm883_vm0, %v882_v1 }
  0x1d   : > { %823 = vmatprep.mubr.msk.bf16.mxu1 %vm883_vm0, %v882_v1  ;;  %820 = vmatpush3.bf16.msra.mxu1 %v860_v18 }
  0x1e   : > { %821 = vmatprep.subr.bf16.mxu1 %v882_v1 }
  0x1f   : > { %814 = vmatpush3.bf16.msra.mxu0 %v859_v14 }
  0x20   : > { %827 = vmatprep.subr.bf16.mxu0 %v882_v1 }
  0x21   : > { %822 = vmatpush3.bf16.msra.mxu1 %v862_v20 }
  0x22   : > { %816 = vmatmul.mubr.msk.bf16.vlgmr.msra.gmra.mxu0 %vm228_vm1, %v243_v17  ;;  %835 = vmatprep.subr.bf16.mxu1 %v882_v1 }
  0x23   : > { %831 = vmatprep.mubr.msk.bf16.mxu0 %vm883_vm0, %v882_v1  ;;  %828 = vmatpush3.bf16.msra.mxu0 %v861_v19 }
  0x24   : > { %829 = vmatprep.subr.bf16.mxu0 %v882_v1 }
  0x27   : > { %830 = vmatpush3.bf16.msra.mxu0 %v863_v21 }
  0xda   : > { %v302_v22 = vpop.f32.mrf.mxu0 }
  0xdb   : > { %v358_v23 = vpop.f32.mrf.mxu1 }
  0xdc   : > { %v801_v24 = vpop.f32.mrf.mxu0  ;;  %v359_v29 = vadd.f32 %v358_v23, %v302_v22 }
  0xdd   : > { %v809_v25 = vpop.f32.mrf.mxu1 }
  0xde   : > { %v305_v26 = vpop.f32.mrf.mxu0 }
  0xdf   : > { %v361_v27 = vpop.f32.mrf.mxu1 }
  0xe0   : > { %v802_v28 = vpop.f32.mrf.mxu0  ;;  %v362_v35 = vadd.f32 %v361_v27, %v305_v26 }
  0xe1   : > { %v810_v30 = vpop.f32.mrf.mxu1 }
  0xe2   : > { %v419_v31 = vpop.f32.mrf.mxu0 }
  0xe3   : > { %v426_v33 = vadd.f32 %v419_v31, %v359_v29 }
  0xe4   : > { %v817_v34 = vpop.f32.mrf.mxu0 }
  0xe5   : > { %v435_v36 = vadd.f32 %v752_v32, %v426_v33 }
  0xe6   : > { %v422_v37 = vpop.f32.mrf.mxu0 }
  0xe7   : > { %v437_v38 = vmax.f32 %v435_v36, 0.0  ;;  %v771_v39 = vmul.f32 -1.442695, %v435_v36  ;;  %v427_v40 = vadd.f32 %v422_v37, %v362_v35 }
  0xe8   : > { %v818_v41 = vpop.f32.mrf.mxu0 }
  0xe9   : > { %439 = vst.msk [vmem:[#allocation2 + $0x1] sm:$0xff] %vm228_vm1, %v437_v38  ;;  %866 = vpow2.f32 %v771_v39  ;;  %v436_v42 = vadd.f32 %v752_v32, %v427_v40 }
  0xeb   : > { %v438_v43 = vmax.f32 %v436_v42, 0.0  ;;  %v772_v44 = vmul.f32 -1.442695, %v436_v42 }
  0xed   : > { %440 = vst.msk [vmem:[#allocation2 + $0x9] sm:$0xff] %vm228_vm1, %v438_v43  ;;  %868 = vpow2.f32 %v772_v44 }
  0xf0   : > { %v444_v45 = vld [vmem:[#allocation2 + $0x1] sm:$0xff] }
  0xf1   : > { %v441_v48 = vld [vmem:[#allocation2] sm:$0xff] }
  0xf4   : > { %v445_v47 = vld [vmem:[#allocation2 + $0x9] sm:$0xff] }
  0xf5   : > { %v442_v49 = vld [vmem:[#allocation2 + $0x8] sm:$0xff]  ;;  %v446_v50 = vpack.c.bf16 %v445_v47, %v444_v45 }
  0xf6   : > { %v443_v51 = vpack.c.bf16 %v442_v49, %v441_v48  ;;  %v867_v52 = vpop.eup %866  ;;  %v447_v56 = vld [vmem:[#allocation2 + $0x2] sm:$0xff]  ;;  %v448_v57 = vld [vmem:[#allocation2 + $0xa] sm:$0xff] }
  0xf7   : > { %v653_v53 = vadd.f32 1.0, %v867_v52  ;;  %824 = vmatmul.mubr.msk.bf16.vlgmr.msra.gmra.mxu1 %vm228_vm1, %v446_v50  ;;  %v449_v59 = vpack.c.bf16 %v448_v57, %v447_v56 }
  0xf8   : > { %832 = vmatmul.mubr.msk.bf16.vlgmr.msra.gmra.mxu0 %vm228_vm1, %v443_v51  ;;  %836 = vmatpush3.bf16.msra.mxu1 %v864_v46 }
  0xf9   : > { %839 = vmatprep.mubr.msk.bf16.mxu1 %vm883_vm0, %v882_v1  ;;  %870 = vrcp.f32 %v653_v53  ;;  %837 = vmatprep.subr.bf16.mxu1 %v882_v1 }
  0xfa   : > { %v869_v55 = vpop.eup %868 }
  0xfb   : > { %v654_v58 = vadd.f32 1.0, %v869_v55 }
  0xfc   : > { %838 = vmatpush3.bf16.msra.mxu1 %v865_v54 }
  0xfd   : > { %872 = vrcp.f32 %v654_v58 }
  0xff   : > { %840 = vmatmul.mubr.msk.bf16.vlgmr.msra.gmra.mxu1 %vm228_vm1, %v449_v59 }
 0x106   : > { %v871_v60 = vpop.eup %870 }
 0x107   : > { %661 = vrot.lane.b32.xlu0 %v871_v60, %s884_s27 }
 0x10a   : > { %v873_v61 = vpop.eup %872 }
 0x10b   : > { %663 = vrot.lane.b32.xlu0 %v873_v61, %s884_s27 }
 0x179   : > { %v662_v18 = vpop.permute.xlu0 %661 }
 0x17d   : > { %v664_v25 = vpop.permute.xlu0 %663 }
 0x1b7   : > { %v508_v62 = vpop.f32.mrf.mxu1 }
 0x1b8   : > { %v564_v63 = vpop.f32.mrf.mxu0 }
 0x1b9   : > { %v825_v0 = vpop.f32.mrf.mxu1  ;;  %v565_v8 = vadd.f32 %v564_v63, %v508_v62 }
 0x1ba   : > { %v833_v2 = vpop.f32.mrf.mxu0 }
 0x1bb   : > { %v511_v3 = vpop.f32.mrf.mxu1 }
 0x1bc   : > { %v567_v1 = vpop.f32.mrf.mxu0 }
 0x1bd   : > { %v826_v4 = vpop.f32.mrf.mxu1  ;;  %v568_v13 = vadd.f32 %v567_v1, %v511_v3 }
 0x1be   : > { %v834_v7 = vpop.f32.mrf.mxu0 }
 0x1bf   : > { %v625_v9 = vpop.f32.mrf.mxu1 }
 0x1c0   : > { %v632_v11 = vadd.f32 %v625_v9, %v565_v8 }
 0x1c1   : > { %v841_v12 = vpop.f32.mrf.mxu1 }
 0x1c2   : > { %v641_v14 = vadd.f32 %v770_v10, %v632_v11 }
 0x1c3   : > { %v628_v15 = vpop.f32.mrf.mxu1 }
 0x1c4   : > { %v643_v16 = vadd.f32 %v641_v14, %v957_v5  ;;  %v633_v17 = vadd.f32 %v628_v15, %v568_v13 }
 0x1c5   : > { %v842_v19 = vpop.f32.mrf.mxu1 }
 0x1c6   : > { %v645_v20 = vmax.f32 %v643_v16, 0.0  ;;  %v642_v21 = vadd.f32 %v770_v10, %v633_v17 }
 0x1c8   : > { %v667_v22 = vmul.f32 %v662_v18, %v645_v20  ;;  %v644_v23 = vadd.f32 %v642_v21, %v959_v6 }
 0x1ca   : > { %669 = vst.msk [vmem:[%s224_s8] sm:$0xff] %vm228_vm1, %v667_v22  ;;  %v646_v24 = vmax.f32 %v644_v23, 0.0 }
 0x1cc   : > { %v668_v26 = vmul.f32 %v664_v25, %v646_v24 }
 0x1ce   : > { %670 = vst.msk [vmem:[%s224_s8 + $0x8] sm:$0xff] %vm228_vm1, %v668_v26 }
 0x1cf PF: > { %s15_s18 = sadd.s32 1, %s880_s18  }
 0x1d0   : > { %p12_p4 = scmp.ge.s32.totalorder %s15_s18, 4  }
 0x1d2   :  { %14 = sbr.rel (!%p12_p4) target bundleno = 1 (0x1), region = 74 }

</bundles_post_ra>
